<compile_context>
chip_gen: v7x
topology: tpu7x:2x2x1
jax: 0.10.0
libtpu: 0.0.40
codegen_flags: <defaults>
</compile_context>

<pallas_src>
import functools

import jax
import jax.numpy as jnp
import numpy as np
from jax import lax
from jax.experimental import pallas as pl
from jax.experimental.pallas import tpu as pltpu

BN_EPS = 1e-5


def _pool_linear_kernel(x_ref, w_ref, b_ref, out_ref, acc_ref, *,
                        hw_total, hw_chunk, mask_tail):
    """Sum-pool HW chunks into an f32 scratch, then (bn,C)@(C,Kp) + bias.

    x_ref:   (bn, C, hw_chunk)  native dtype -- one (N-tile, HW-chunk) of input
    w_ref:   (C, Kp)  f32       BN- and 1/HW-folded classifier weight (lane padded)
    b_ref:   (1, Kp)  f32       folded bias (lane padded)
    out_ref: (bn, Kp) f32       padded logits (written on the last HW chunk)
    acc_ref: (bn, C)  f32       running spatial sum (scratch)
    """
    k = pl.program_id(1)

    @pl.when(k == 0)
    def _init():
        acc_ref[...] = jnp.zeros_like(acc_ref)

    x = x_ref[...].astype(jnp.float32)                       # (bn, C, hw_chunk)
    if mask_tail:                                            # static decision
        pos = k * hw_chunk + lax.broadcasted_iota(jnp.int32, x.shape, 2)
        x = jnp.where(pos < hw_total, x, 0.0)
    acc_ref[...] += jnp.sum(x, axis=-1)                      # lane reduce (XLU)

    @pl.when(k == pl.num_programs(1) - 1)
    def _finalize():
        logits = jnp.dot(acc_ref[...], w_ref[...],
                         preferred_element_type=jnp.float32) + b_ref[...]
        out_ref[...] = logits.astype(out_ref.dtype)


def _vmem_limit_bytes():
    """Scoped-VMEM limit to request: ~3/4 of per-core physical VMEM, capped."""
    cap = None
    try:
        cap = getattr(pltpu.get_tpu_info(), "vmem_capacity_bytes", None)
    except Exception:
        cap = None
    if not cap:
        cap = 64 * 1024 * 1024            # conservative (v7x per-TC physical)
    return min(int(cap) * 3 // 4, 96 * 1024 * 1024)


def _choose_tiling(N, C, HW, Kp, in_itemsize, budget_bytes):
    """Pick (bn, hw_chunk, n_hw) so the FULL working set fits the VMEM budget.

    Working set = 2x input block + 2x output block + f32 accumulator
                  + folded weight (single-buffered) + folded bias.
    """
    fixed = C * Kp * 4 + 8 * Kp * 4                 # weight + sublane-padded bias
    avail = max(budget_bytes - fixed, 2 * 1024 * 1024)

    # HW (reduction) chunking: bound the input block independent of feature-map
    # size so that an 8-row, double-buffered input block uses <= ~half of what
    # is left after the fixed residents.
    max_chunk = max(128, avail // (4 * 8 * C * in_itemsize))
    if HW <= max_chunk:
        hw_chunk = HW                               # single chunk, no masking
    else:
        hw_chunk = max(128, (max_chunk // 128) * 128)   # lane-aligned chunks
    n_hw = pl.cdiv(HW, hw_chunk)

    # N tiling: fill the budget, but keep several grid steps along the batch
    # axis (>=2, ideally 4) so both v7x TensorCores get work and DMA pipelines.
    per_row = (2 * C * hw_chunk * in_itemsize       # double-buffered input block
               + 2 * Kp * 4                         # double-buffered output block
               + C * 4)                             # f32 accumulator scratch
    bn = max(1, avail // per_row)
    if N >= 32:
        target_tiles = 4
    elif N >= 2:
        target_tiles = 2
    else:
        target_tiles = 1
    bn = min(bn, max(1, pl.cdiv(N, target_tiles)), N)

    # Output block's second-to-last dim must be a multiple of 8 or equal N.
    # Round DOWN (never inflate past budget); 8 rows always fit by construction
    # of hw_chunk, so bumping a sub-8 result up to 8 is safe.
    if bn >= N:
        bn = N
    elif bn < 8:
        bn = min(8, N)
    else:
        bn = (bn // 8) * 8
    return int(bn), int(hw_chunk), int(n_hw)


def early_exit_block_bnpool(x_nchw, gamma, beta, running_mean, running_var, w, b):
    """x_nchw: (N, C, H, W); returns logits (N, n_classes) float32."""
    N, C, H, W = x_nchw.shape
    HW = H * W
    n_classes = w.shape[0]                           # torch Linear weight is (out, in)

    # ---- Fold BatchNorm2d (inference) and 1/HW into the classifier (once) ----
    inv_std = 1.0 / jnp.sqrt(running_var.astype(jnp.float32) + BN_EPS)  # (C,)
    scale = gamma.astype(jnp.float32) * inv_std                          # (C,)
    shift = beta.astype(jnp.float32) - running_mean.astype(jnp.float32) * scale
    wt = w.astype(jnp.float32).T                                         # (C, K)
    w_folded = (scale[:, None] * wt) * (1.0 / HW)                        # (C, K)
    b_folded = shift @ wt + b.astype(jnp.float32)                        # (K,)

    # ---- Lane-dense output: pad classes up to a multiple of 128 ----
    Kp = max(128, ((n_classes + 127) // 128) * 128)
    w_pad = jnp.zeros((C, Kp), jnp.float32).at[:, :n_classes].set(w_folded)
    b_pad = jnp.zeros((1, Kp), jnp.float32).at[0, :n_classes].set(b_folded)

    # Keep the input in its NATIVE dtype (no extra f32 copy pass over HBM).
    x3 = x_nchw.reshape(N, C, HW)
    in_itemsize = x3.dtype.itemsize

    vmem_limit = _vmem_limit_bytes()
    bn, hw_chunk, n_hw = _choose_tiling(N, C, HW, Kp, in_itemsize,
                                        budget_bytes=int(vmem_limit * 0.8))
    grid = (pl.cdiv(N, bn), n_hw)

    kernel = functools.partial(_pool_linear_kernel,
                               hw_total=HW, hw_chunk=hw_chunk,
                               mask_tail=(HW % hw_chunk != 0))

    cost = pl.CostEstimate(
        flops=2 * N * C * Kp + N * C * HW,
        transcendentals=0,
        bytes_accessed=(x3.size * in_itemsize
                        + (w_pad.size + b_pad.size + N * Kp) * 4),
    )

    def _call(single_buffer_invariants):
        inv_kwargs = ({"pipeline_mode": pl.Buffered(1)}
                      if single_buffer_invariants else {})
        return pl.pallas_call(
            kernel,
            out_shape=jax.ShapeDtypeStruct((N, Kp), jnp.float32),
            grid=grid,
            in_specs=[
                pl.BlockSpec((bn, C, hw_chunk), lambda i, k: (i, 0, k)),
                pl.BlockSpec((C, Kp), lambda i, k: (0, 0), **inv_kwargs),
                pl.BlockSpec((1, Kp), lambda i, k: (0, 0), **inv_kwargs),
            ],
            out_specs=pl.BlockSpec((bn, Kp), lambda i, k: (i, 0)),
            scratch_shapes=[pltpu.VMEM((bn, C), jnp.float32)],
            compiler_params=pltpu.CompilerParams(
                dimension_semantics=("parallel", "arbitrary"),
                vmem_limit_bytes=vmem_limit),
            cost_estimate=cost,
        )(x3, w_pad, b_pad)

    try:
        out_padded = _call(True)
    except Exception:
        # Fallback if this JAX version rejects single-buffered pipeline_mode.
        out_padded = _call(False)

    return out_padded[:, :n_classes]


def _reference(x_nchw, gamma, beta, running_mean, running_var, w, b):
    """Plain-JAX reference of the same forward (for a sanity check)."""
    xn = (x_nchw - running_mean[None, :, None, None]) \
         / jnp.sqrt(running_var[None, :, None, None] + BN_EPS)
    xn = xn * gamma[None, :, None, None] + beta[None, :, None, None]
    pooled = jnp.mean(xn, axis=(2, 3))               # (N, C)
    return pooled @ w.T + b[None, :]


if __name__ == "__main__":
    # Small shapes consistent with the module: input_shape = (N, C, H, W)
    N, C, H, W = 2, 4, 16, 16
    n_classes = 10

    key = jax.random.PRNGKey(0)
    kx, kg, kb, km, kv, kw, kbias = jax.random.split(key, 7)

    x = jax.random.normal(kx, (N, C, H, W), dtype=jnp.float32)

    # Deterministic BatchNorm2d parameters / running stats (inference mode)
    gamma = 1.0 + 0.1 * jax.random.normal(kg, (C,), dtype=jnp.float32)
    beta = 0.1 * jax.random.normal(kb, (C,), dtype=jnp.float32)
    running_mean = 0.05 * jax.random.normal(km, (C,), dtype=jnp.float32)
    running_var = 1.0 + 0.1 * jax.random.uniform(kv, (C,), dtype=jnp.float32)

    # Deterministic Linear(C, n_classes) parameters (torch layout: weight (out, in))
    w = 0.2 * jax.random.normal(kw, (n_classes, C), dtype=jnp.float32)
    b = 0.05 * jax.random.normal(kbias, (n_classes,), dtype=jnp.float32)

    out = early_exit_block_bnpool(x, gamma, beta, running_mean, running_var, w, b)
    out = jax.block_until_ready(out)

    ref = _reference(x, gamma, beta, running_mean, running_var, w, b)
    if not np.allclose(np.asarray(out), np.asarray(ref), atol=1e-4, rtol=1e-4):
        raise AssertionError("Pallas kernel output does not match reference")

    print("KERNEL_OK")
</pallas_src>

<mosaic_0001>
module attributes {stable_mosaic.version = 11 : i64} {
  func.func @_pool_linear_kernel(%arg0: i32, %arg1: i32, %arg2: memref<2x4x256xf32, #tpu.memory_space<vmem>>, %arg3: memref<4x128xf32, #tpu.memory_space<vmem>>, %arg4: memref<1x128xf32, #tpu.memory_space<vmem>>, %arg5: memref<2x128xf32, #tpu.memory_space<vmem>>, %arg6: memref<2x4xf32, #tpu.memory_space<vmem>>) attributes {dimension_semantics = [#tpu.dimension_semantics<parallel>, #tpu.dimension_semantics<arbitrary>], iteration_bounds = array<i64: 1, 1>, scalar_prefetch = 0 : i64, scratch_operands = 1 : i64, tpu.core_type = #tpu.core_type<tc>, window_params = [{transform_indices = @transform_0, window_bounds = array<i64: 2, 4, 256>}, {pipeline_mode = #tpu.pipeline_mode<synchronous>, transform_indices = @transform_1, window_bounds = array<i64: 4, 128>}, {pipeline_mode = #tpu.pipeline_mode<synchronous>, transform_indices = @transform_2, window_bounds = array<i64: 1, 128>}, {transform_indices = @transform_3, window_bounds = array<i64: 2, 128>}]} {
    %c0_i32 = arith.constant 0 : i32
    %0 = arith.cmpi eq, %arg1, %c0_i32 : i32
    %1 = arith.extui %0 : i1 to i32
    %c0_i32_0 = arith.constant 0 : i32
    %2 = arith.cmpi ne, %1, %c0_i32_0 : i32
    scf.if %2 {
      %cst_9 = arith.constant 0.000000e+00 : f32
      %11 = vector.broadcast %cst_9 : f32 to vector<2x4xf32>
      %c0_10 = arith.constant 0 : index
      %c0_11 = arith.constant 0 : index
      %12 = vector.load %arg6[%c0_10, %c0_11] : memref<2x4xf32, #tpu.memory_space<vmem>>, vector<2x4xf32>
      tpu.vector_store %arg6[%c0_10, %c0_11], %11 {strides = array<i32>} : memref<2x4xf32, #tpu.memory_space<vmem>>, vector<2x4xf32>,
    } else {
    }
    %c0 = arith.constant 0 : index
    %c0_1 = arith.constant 0 : index
    %c0_2 = arith.constant 0 : index
    %3 = vector.load %arg2[%c0, %c0_1, %c0_2] : memref<2x4x256xf32, #tpu.memory_space<vmem>>, vector<2x4x256xf32>
    %c0_3 = arith.constant 0 : index
    %c0_4 = arith.constant 0 : index
    %4 = vector.load %arg6[%c0_3, %c0_4] : memref<2x4xf32, #tpu.memory_space<vmem>>, vector<2x4xf32>
    %cst = arith.constant dense<0.000000e+00> : vector<2x4xf32>
    %5 = vector.multi_reduction <add>, %3, %cst [2] : vector<2x4x256xf32> to vector<2x4xf32>
    %6 = arith.addf %4, %5 : vector<2x4xf32>
    %c0_5 = arith.constant 0 : index
    %c0_6 = arith.constant 0 : index
    %7 = vector.load %arg6[%c0_5, %c0_6] : memref<2x4xf32, #tpu.memory_space<vmem>>, vector<2x4xf32>
    tpu.vector_store %arg6[%c0_5, %c0_6], %6 {strides = array<i32>} : memref<2x4xf32, #tpu.memory_space<vmem>>, vector<2x4xf32>,
    %c0_i32_7 = arith.constant 0 : i32
    %8 = arith.cmpi eq, %arg1, %c0_i32_7 : i32
    %9 = arith.extui %8 : i1 to i32
    %c0_i32_8 = arith.constant 0 : i32
    %10 = arith.cmpi ne, %9, %c0_i32_8 : i32
    scf.if %10 {
      %c0_9 = arith.constant 0 : index
      %c0_10 = arith.constant 0 : index
      %11 = vector.load %arg6[%c0_9, %c0_10] : memref<2x4xf32, #tpu.memory_space<vmem>>, vector<2x4xf32>
      %c0_11 = arith.constant 0 : index
      %c0_12 = arith.constant 0 : index
      %12 = vector.load %arg3[%c0_11, %c0_12] : memref<4x128xf32, #tpu.memory_space<vmem>>, vector<4x128xf32>
      %cst_13 = arith.constant dense<0.000000e+00> : vector<2x128xf32>
      %13 = tpu.matmul %11, %12, %cst_13 {dimension_numbers = #tpu.dot_dimension_numbers<[1], [0], [0], [1], [0, 0, 1, 1], [], []>} : vector<2x4xf32>, vector<4x128xf32>, vector<2x128xf32> -> vector<2x128xf32>
      %c0_14 = arith.constant 0 : index
      %c0_15 = arith.constant 0 : index
      %14 = vector.load %arg4[%c0_14, %c0_15] : memref<1x128xf32, #tpu.memory_space<vmem>>, vector<1x128xf32>
      %15 = vector.broadcast %14 : vector<1x128xf32> to vector<2x128xf32>
      %16 = arith.addf %13, %15 : vector<2x128xf32>
      %c0_16 = arith.constant 0 : index
      %c0_17 = arith.constant 0 : index
      %17 = vector.load %arg5[%c0_16, %c0_17] : memref<2x128xf32, #tpu.memory_space<vmem>>, vector<2x128xf32>
      tpu.vector_store %arg5[%c0_16, %c0_17], %16 {strides = array<i32>} : memref<2x128xf32, #tpu.memory_space<vmem>>, vector<2x128xf32>,
    } else {
    }
    return
  }
  func.func @transform_0(%arg0: i32, %arg1: i32) -> (i32, i32, i32) {
    %c0_i32 = arith.constant 0 : i32
    %c0_i32_0 = arith.constant 0 : i32
    return %arg0, %c0_i32, %arg1 : i32, i32, i32
  }
  func.func @transform_1(%arg0: i32, %arg1: i32) -> (i32, i32) {
    %c0_i32 = arith.constant 0 : i32
    %c0_i32_0 = arith.constant 0 : i32
    %c0_i32_1 = arith.constant 0 : i32
    return %c0_i32, %c0_i32_0 : i32, i32
  }
  func.func @transform_2(%arg0: i32, %arg1: i32) -> (i32, i32) {
    %c0_i32 = arith.constant 0 : i32
    %c0_i32_0 = arith.constant 0 : i32
    %c0_i32_1 = arith.constant 0 : i32
    return %c0_i32, %c0_i32_0 : i32, i32
  }
  func.func @transform_3(%arg0: i32, %arg1: i32) -> (i32, i32) {
    %c0_i32 = arith.constant 0 : i32
    %c0_i32_0 = arith.constant 0 : i32
    return %arg0, %c0_i32 : i32, i32
  }
}

module attributes {stable_mosaic.version = 11 : i64} {
  func.func @_pool_linear_kernel(%arg0: i32, %arg1: i32, %arg2: memref<2x4x256xf32, #tpu.memory_space<vmem>>, %arg3: memref<4x128xf32, #tpu.memory_space<vmem>>, %arg4: memref<1x128xf32, #tpu.memory_space<vmem>>, %arg5: memref<2x128xf32, #tpu.memory_space<vmem>>, %arg6: memref<2x4xf32, #tpu.memory_space<vmem>>) attributes {dimension_semantics = [#tpu.dimension_semantics<parallel>, #tpu.dimension_semantics<arbitrary>], iteration_bounds = array<i64: 1, 1>, scalar_prefetch = 0 : i64, scratch_operands = 1 : i64, tpu.core_type = #tpu.core_type<tc>, window_params = [{transform_indices = @transform_0, window_bounds = array<i64: 2, 4, 256>}, {pipeline_mode = #tpu.pipeline_mode<synchronous>, transform_indices = @transform_1, window_bounds = array<i64: 4, 128>}, {pipeline_mode = #tpu.pipeline_mode<synchronous>, transform_indices = @transform_2, window_bounds = array<i64: 1, 128>}, {transform_indices = @transform_3, window_bounds = array<i64: 2, 128>}]} {
    %c0_i32 = arith.constant 0 : i32
    %0 = arith.cmpi eq, %arg1, %c0_i32 : i32
    %1 = arith.extui %0 : i1 to i32
    %c0_i32_0 = arith.constant 0 : i32
    %2 = arith.cmpi ne, %1, %c0_i32_0 : i32
    scf.if %2 {
      %cst_9 = arith.constant 0.000000e+00 : f32
      %11 = vector.broadcast %cst_9 : f32 to vector<2x4xf32>
      %c0_10 = arith.constant 0 : index
      %c0_11 = arith.constant 0 : index
      %12 = vector.load %arg6[%c0_10, %c0_11] : memref<2x4xf32, #tpu.memory_space<vmem>>, vector<2x4xf32>
      tpu.vector_store %arg6[%c0_10, %c0_11], %11 {strides = array<i32>} : memref<2x4xf32, #tpu.memory_space<vmem>>, vector<2x4xf32>,
    } else {
    }
    %c0 = arith.constant 0 : index
    %c0_1 = arith.constant 0 : index
    %c0_2 = arith.constant 0 : index
    %3 = vector.load %arg2[%c0, %c0_1, %c0_2] : memref<2x4x256xf32, #tpu.memory_space<vmem>>, vector<2x4x256xf32>
    %c0_3 = arith.constant 0 : index
    %c0_4 = arith.constant 0 : index
    %4 = vector.load %arg6[%c0_3, %c0_4] : memref<2x4xf32, #tpu.memory_space<vmem>>, vector<2x4xf32>
    %cst = arith.constant dense<0.000000e+00> : vector<2x4xf32>
    %5 = vector.multi_reduction <add>, %3, %cst [2] : vector<2x4x256xf32> to vector<2x4xf32>
    %6 = arith.addf %4, %5 : vector<2x4xf32>
    %c0_5 = arith.constant 0 : index
    %c0_6 = arith.constant 0 : index
    %7 = vector.load %arg6[%c0_5, %c0_6] : memref<2x4xf32, #tpu.memory_space<vmem>>, vector<2x4xf32>
    tpu.vector_store %arg6[%c0_5, %c0_6], %6 {strides = array<i32>} : memref<2x4xf32, #tpu.memory_space<vmem>>, vector<2x4xf32>,
    %c0_i32_7 = arith.constant 0 : i32
    %8 = arith.cmpi eq, %arg1, %c0_i32_7 : i32
    %9 = arith.extui %8 : i1 to i32
    %c0_i32_8 = arith.constant 0 : i32
    %10 = arith.cmpi ne, %9, %c0_i32_8 : i32
    scf.if %10 {
      %c0_9 = arith.constant 0 : index
      %c0_10 = arith.constant 0 : index
      %11 = vector.load %arg6[%c0_9, %c0_10] : memref<2x4xf32, #tpu.memory_space<vmem>>, vector<2x4xf32>
      %c0_11 = arith.constant 0 : index
      %c0_12 = arith.constant 0 : index
      %12 = vector.load %arg3[%c0_11, %c0_12] : memref<4x128xf32, #tpu.memory_space<vmem>>, vector<4x128xf32>
      %cst_13 = arith.constant dense<0.000000e+00> : vector<2x128xf32>
      %13 = tpu.matmul %11, %12, %cst_13 {dimension_numbers = #tpu.dot_dimension_numbers<[1], [0], [0], [1], [0, 0, 1, 1], [], []>} : vector<2x4xf32>, vector<4x128xf32>, vector<2x128xf32> -> vector<2x128xf32>
      %c0_14 = arith.constant 0 : index
      %c0_15 = arith.constant 0 : index
      %14 = vector.load %arg4[%c0_14, %c0_15] : memref<1x128xf32, #tpu.memory_space<vmem>>, vector<1x128xf32>
      %15 = vector.broadcast %14 : vector<1x128xf32> to vector<2x128xf32>
      %16 = arith.addf %13, %15 : vector<2x128xf32>
      %c0_16 = arith.constant 0 : index
      %c0_17 = arith.constant 0 : index
      %17 = vector.load %arg5[%c0_16, %c0_17] : memref<2x128xf32, #tpu.memory_space<vmem>>, vector<2x128xf32>
      tpu.vector_store %arg5[%c0_16, %c0_17], %16 {strides = array<i32>} : memref<2x128xf32, #tpu.memory_space<vmem>>, vector<2x128xf32>,
    } else {
    }
    return
  }
  func.func @transform_0(%arg0: i32, %arg1: i32) -> (i32, i32, i32) {
    %c0_i32 = arith.constant 0 : i32
    %c0_i32_0 = arith.constant 0 : i32
    return %arg0, %c0_i32, %arg1 : i32, i32, i32
  }
  func.func @transform_1(%arg0: i32, %arg1: i32) -> (i32, i32) {
    %c0_i32 = arith.constant 0 : i32
    %c0_i32_0 = arith.constant 0 : i32
    %c0_i32_1 = arith.constant 0 : i32
    return %c0_i32, %c0_i32_0 : i32, i32
  }
  func.func @transform_2(%arg0: i32, %arg1: i32) -> (i32, i32) {
    %c0_i32 = arith.constant 0 : i32
    %c0_i32_0 = arith.constant 0 : i32
    %c0_i32_1 = arith.constant 0 : i32
    return %c0_i32, %c0_i32_0 : i32, i32
  }
  func.func @transform_3(%arg0: i32, %arg1: i32) -> (i32, i32) {
    %c0_i32 = arith.constant 0 : i32
    %c0_i32_0 = arith.constant 0 : i32
    return %arg0, %c0_i32 : i32, i32
  }
}

</mosaic_0001>

<bundles_post_ra>
// kernel: tpu_custom_call.1
= control target key start
LH: loop header
LB: loop body
LE: loop exit
PB: predicated region body
PF: predicated region fallthrough
CT: control target
= control target key end

     0   :  { %8 = vsyncpa [#allocation4], 0  ;;  %s355_s0 = inlined_call_operand.hbm [shape: f32[2,4,256], index: 0, kind: input, shape index: {}]   ;;  %s356_s1 = inlined_call_operand.hbm [shape: f32[4,128], index: 1, kind: input, shape index: {}]   ;;  %s357_s2 = inlined_call_operand.vmem [shape: f32[1,128], index: 2, kind: input, shape index: {}]   ;;  %s358_s3 = inlined_call_operand.hbm [shape: f32[2,128], index: 3, kind: output, shape index: {}]  }
   0x1   :  { %9 = vsyncpa [#allocation7], 0 }
   0x2   :  { %10 = vsyncpa [#allocation5], 0  ;;  %s282_s12 = smov [#allocation3]   ;;  %s210_s16 = scalar_lea.hbm %s355_s0, 256 }
   0x3   :  { %s16_s13 = sshll.u32 %s282_s12, 4  ;;  %p211_p0 = scmp.ne.s32.totalorder %s355_s0, %s210_s16  ;;  %s17_s13 = int_to_ptr.vmem [resolvable:$true] %s16_s13 }
   0x4   :  { %p214_p1 = scmp.lt.u32.totalorder %s210_s16, %s355_s0 }
   0x6   :  { %p216_p2 = pnand %p214_p1, %p211_p0 }
   0x8   :  { %219 = shalt.err (!%p216_p2)
}
   0x9   :  { %s220_s21 = scalar_lea.vmem %s17_s13, 256  ;;  %p225_p4 = scmp.lt.s32.totalorder %s17_s13, %s17_s13 }
   0xa   :  { %p221_p3 = scmp.ne.s32.totalorder %s17_s13, %s220_s21  ;;  %p226_p5 = scmp.lt.s32.totalorder %s220_s21, %s220_s21 }
   0xc   :  { %p227_p6 = por %p226_p5, %p225_p4 }
   0xe   :  { %p228_p7 = pnand %p227_p6, %p221_p3 }
  0x10   :  { %231 = shalt.err (!%p228_p7)
}
  0x11   :  { %s283_s22 = smov 128   ;;  %s284_s23 = smov 8  }
  0x12   :  { %22 = dma.hbm_to_vmem [thread:$0]  %s355_s0, 256, %s17_s13, [#allocation4], %s283_s22, %s283_s22, %s284_s23  }
  0x13   :  { %s285_s26 = smov [#allocation6]   ;;  %s232_s30 = scalar_lea.hbm %s356_s1, 64 }
  0x14   :  { %s29_s27 = sshll.u32 %s285_s26, 4  ;;  %p233_p8 = scmp.ne.s32.totalorder %s356_s1, %s232_s30  ;;  %s30_s27 = int_to_ptr.vmem [resolvable:$true] %s29_s27 }
  0x15   :  { %p236_p9 = scmp.lt.u32.totalorder %s232_s30, %s356_s1 }
  0x17   :  { %p238_p10 = pnand %p236_p9, %p233_p8 }
  0x19   :  { %241 = shalt.err (!%p238_p10)
}
  0x1a   :  { %s242_s8 = scalar_lea.vmem %s30_s27, 64  ;;  %p247_p12 = scmp.lt.s32.totalorder %s30_s27, %s30_s27 }
  0x1b   :  { %p243_p11 = scmp.ne.s32.totalorder %s30_s27, %s242_s8  ;;  %p248_p13 = scmp.lt.s32.totalorder %s242_s8, %s242_s8 }
  0x1d   :  { %p249_p0 = por %p248_p13, %p247_p12 }
  0x1f   :  { %p250_p1 = pnand %p249_p0, %p243_p11 }
  0x21   :  { %253 = shalt.err (!%p250_p1)
}
  0x22   :  { %32 = dma.hbm_to_vmem [thread:$0]  %s356_s1, 64, %s30_s27, [#allocation7]  }
  0x23   :  { %276 = dma.done.wait [#allocation4], 256  }
  0x24   :  { %277 = vsyncadd [#allocation4], 4294967040 }
  0x25   :  { %278 = dma.done.wait [#allocation7], 64  }
  0x26   :  { %279 = vsyncadd [#allocation7], 4294967232  ;;  %vm56_vm0 = vcmask 1043456   ;;  %v47_v0 = vld [vmem:[#allocation3] sm:$0xff]  ;;  %v48_v1 = vld [vmem:[#allocation3 + $0x8] sm:$0xff]  ;;  %vm45_vm1 = vcmask 25600   ;;  %v69_v12 = vlaneseq }
  0x27   :  { %v52_v2 = vcombine.high %v47_v0, %v47_v0  ;;  %v57_v3 = vsel %vm56_vm0, %v47_v0, 0.0  ;;  %v53_v4 = vcombine.high %v48_v1, %v48_v1  ;;  %v62_v6 = vsel %vm56_vm0, %v48_v1, 0.0  ;;  %v89_v11 = vld [vmem:[#allocation6] sm:$0xf]  ;;  %v191_v24 = vld [vmem:[%s357_s2] ss:$0 sm:$0xff] }
  0x28   :  { %v286_v10 = vmov 0.0   ;;  %vm287_vm2 = vmmov 0   ;;  %v70_v13 = vand.u32 127, %v69_v12  ;;  %v72_v14 = vshrl.u32 %v69_v12, 7  ;;  %s288_s11 = smov [#allocation8]  }
  0x29   :  { %v58_v5 = vsel %vm56_vm0, %v52_v2, 0.0  ;;  %v63_v7 = vsel %vm56_vm0, %v53_v4, 0.0  ;;  %46 = vst.msk [vmem:[#allocation2] sm:$0x3] %vm45_vm1, %v286_v10  ;;  %196 = vmatprep.subr.mxu0 %v286_v10  ;;  %198 = vmatprep.mubr.msk.f32.mxu0 %vm287_vm2, %v286_v10  ;;  %vm79_vm3 = vcmask 1041409   ;;  %vm97_vm4 = vcmask 31744  }
  0x2a   :  { %v59_v8 = vadd.f32 %v58_v5, %v57_v3  ;;  %v64_v9 = vadd.f32 %v63_v7, %v62_v6  ;;  %197 = vmatpush3.msk.msra.mxu0 %vm56_vm0, %v89_v11  ;;  %v73_v16 = vsub.s32 %v70_v13, %v72_v14  ;;  %s181_s12 = sshll.u32 %s288_s11, 4  ;;  %s182_s12 = int_to_ptr.vmem [resolvable:$true] %s181_s12 }
  0x2b   :  { %s254_s13 = scalar_lea.vmem %s182_s12, 32  ;;  %p259_p3 = scmp.lt.s32.totalorder %s182_s12, %s182_s12 }
  0x2c   :  { %60 = vadd.xlane.f32.xlu0 %v59_v8  ;;  %p255_p2 = scmp.ne.s32.totalorder %s182_s12, %s254_s13  ;;  %p260_p4 = scmp.lt.s32.totalorder %s254_s13, %s254_s13 }
  0x2e   :  { %p261_p5 = por %p260_p4, %p259_p3 }
  0x30   :  { %65 = vadd.xlane.f32.xlu0 %v64_v9  ;;  %v49_v20 = vld [vmem:[#allocation2] sm:$0x3]  ;;  %p262_p6 = pnand %p261_p5, %p255_p2 }
  0xb9   :  { %v61_v15 = vpop.xlane.xlu0 %60 }
  0xba   :  { %v74_v18 = vrot.slane %v61_v15, %v73_v16 }
  0xbd   :  { %v66_v17 = vpop.xlane.xlu0 %65 }
  0xbe   :  { %v78_v19 = vrot.slane %v66_v17, %v73_v16 }
  0xc0   :  { %v80_v21 = vsel %vm79_vm3, %v78_v19, %v74_v18 }
  0xc1   :  { %v82_v22 = vadd.f32 %v80_v21, %v49_v20 }
  0xc3   :  { %84 = vst.msk [vmem:[#allocation2] sm:$0x3] %vm45_vm1, %v82_v22 }
  0xca   :  { %v88_v23 = vld [vmem:[#allocation2] sm:$0x3] }
  0xcb   :  { %199 = vmatmul.mubr.msk.f32.vlgmr.msra.gmra.mrb[0].mxu0 %vm97_vm4, %v88_v23 }
 0x19e   :  { %v170_v25 = vpop.f32.mrb[0].mxu0 }
 0x19f   :  { %v171_v26 = vadd.f32 %v191_v24, %v170_v25  ;;  %v200_v27 = vpop.f32.mrb[1].mxu0 }
 0x1a1   :  { %174 = vst [vmem:[#allocation8] sm:$0x3] %v171_v26 }
 0x1a2   :  { %265 = shalt.err (!%p262_p6)
}
 0x1a3   :  { %s266_s16 = scalar_lea.hbm %s358_s3, 32 }
 0x1a4   :  { %p267_p7 = scmp.ne.s32.totalorder %s358_s3, %s266_s16  ;;  %p270_p8 = scmp.lt.u32.totalorder %s266_s16, %s358_s3 }
 0x1a6   :  { %p272_p9 = pnand %p270_p8, %p267_p7 }
 0x1a8   :  { %275 = shalt.err (!%p272_p9)
}
 0x1a9   :  { %184 = dma.vmem_to_hbm [thread:$0]  %s182_s12, 32, %s358_s3, [#allocation5]  }
 0x1aa   :  { %280 = dma.done.wait [#allocation5], 32  }
 0x1ab   :  { %281 = vsyncadd [#allocation5], 4294967264 }
 0x1ac   :  { %188 = vsyncpa [#allocation4], 1 }
 0x1ad   :  { %189 = vsyncpa [#allocation7], 1 }
 0x1ae   :  { %190 = vsyncpa [#allocation5], 1 }

// kernel: tpu_custom_call.1
= control target key start
LH: loop header
LB: loop body
LE: loop exit
PB: predicated region body
PF: predicated region fallthrough
CT: control target
= control target key end

     0   :  { %8 = vsyncpa [#allocation4], 0  ;;  %s355_s0 = inlined_call_operand.hbm [shape: f32[2,4,256], index: 0, kind: input, shape index: {}]   ;;  %s356_s1 = inlined_call_operand.hbm [shape: f32[4,128], index: 1, kind: input, shape index: {}]   ;;  %s357_s2 = inlined_call_operand.vmem [shape: f32[1,128], index: 2, kind: input, shape index: {}]   ;;  %s358_s3 = inlined_call_operand.hbm [shape: f32[2,128], index: 3, kind: output, shape index: {}]  }
   0x1   :  { %9 = vsyncpa [#allocation7], 0 }
   0x2   :  { %10 = vsyncpa [#allocation5], 0  ;;  %s282_s12 = smov [#allocation3]   ;;  %s210_s16 = scalar_lea.hbm %s355_s0, 256 }
   0x3   :  { %s16_s13 = sshll.u32 %s282_s12, 4  ;;  %p211_p0 = scmp.ne.s32.totalorder %s355_s0, %s210_s16  ;;  %s17_s13 = int_to_ptr.vmem [resolvable:$true] %s16_s13 }
   0x4   :  { %p214_p1 = scmp.lt.u32.totalorder %s210_s16, %s355_s0 }
   0x6   :  { %p216_p2 = pnand %p214_p1, %p211_p0 }
   0x8   :  { %219 = shalt.err (!%p216_p2)
}
   0x9   :  { %s220_s21 = scalar_lea.vmem %s17_s13, 256  ;;  %p225_p4 = scmp.lt.s32.totalorder %s17_s13, %s17_s13 }
   0xa   :  { %p221_p3 = scmp.ne.s32.totalorder %s17_s13, %s220_s21  ;;  %p226_p5 = scmp.lt.s32.totalorder %s220_s21, %s220_s21 }
   0xc   :  { %p227_p6 = por %p226_p5, %p225_p4 }
   0xe   :  { %p228_p7 = pnand %p227_p6, %p221_p3 }
  0x10   :  { %231 = shalt.err (!%p228_p7)
}
  0x11   :  { %s283_s22 = smov 128   ;;  %s284_s23 = smov 8  }
  0x12   :  { %22 = dma.hbm_to_vmem [thread:$0]  %s355_s0, 256, %s17_s13, [#allocation4], %s283_s22, %s283_s22, %s284_s23  }
  0x13   :  { %s285_s26 = smov [#allocation6]   ;;  %s232_s30 = scalar_lea.hbm %s356_s1, 64 }
  0x14   :  { %s29_s27 = sshll.u32 %s285_s26, 4  ;;  %p233_p8 = scmp.ne.s32.totalorder %s356_s1, %s232_s30  ;;  %s30_s27 = int_to_ptr.vmem [resolvable:$true] %s29_s27 }
  0x15   :  { %p236_p9 = scmp.lt.u32.totalorder %s232_s30, %s356_s1 }
  0x17   :  { %p238_p10 = pnand %p236_p9, %p233_p8 }
  0x19   :  { %241 = shalt.err (!%p238_p10)
}
  0x1a   :  { %s242_s8 = scalar_lea.vmem %s30_s27, 64  ;;  %p247_p12 = scmp.lt.s32.totalorder %s30_s27, %s30_s27 }
  0x1b   :  { %p243_p11 = scmp.ne.s32.totalorder %s30_s27, %s242_s8  ;;  %p248_p13 = scmp.lt.s32.totalorder %s242_s8, %s242_s8 }
  0x1d   :  { %p249_p0 = por %p248_p13, %p247_p12 }
  0x1f   :  { %p250_p1 = pnand %p249_p0, %p243_p11 }
  0x21   :  { %253 = shalt.err (!%p250_p1)
}
  0x22   :  { %32 = dma.hbm_to_vmem [thread:$0]  %s356_s1, 64, %s30_s27, [#allocation7]  }
  0x23   :  { %276 = dma.done.wait [#allocation4], 256  }
  0x24   :  { %277 = vsyncadd [#allocation4], 4294967040 }
  0x25   :  { %278 = dma.done.wait [#allocation7], 64  }
  0x26   :  { %279 = vsyncadd [#allocation7], 4294967232  ;;  %vm56_vm0 = vcmask 1043456   ;;  %v47_v0 = vld [vmem:[#allocation3] sm:$0xff]  ;;  %v48_v1 = vld [vmem:[#allocation3 + $0x8] sm:$0xff]  ;;  %vm45_vm1 = vcmask 25600   ;;  %v69_v12 = vlaneseq }
  0x27   :  { %v52_v2 = vcombine.high %v47_v0, %v47_v0  ;;  %v57_v3 = vsel %vm56_vm0, %v47_v0, 0.0  ;;  %v53_v4 = vcombine.high %v48_v1, %v48_v1  ;;  %v62_v6 = vsel %vm56_vm0, %v48_v1, 0.0  ;;  %v89_v11 = vld [vmem:[#allocation6] sm:$0xf]  ;;  %v191_v24 = vld [vmem:[%s357_s2] ss:$0 sm:$0xff] }
  0x28   :  { %v286_v10 = vmov 0.0   ;;  %vm287_vm2 = vmmov 0   ;;  %v70_v13 = vand.u32 127, %v69_v12  ;;  %v72_v14 = vshrl.u32 %v69_v12, 7  ;;  %s288_s11 = smov [#allocation8]  }
  0x29   :  { %v58_v5 = vsel %vm56_vm0, %v52_v2, 0.0  ;;  %v63_v7 = vsel %vm56_vm0, %v53_v4, 0.0  ;;  %46 = vst.msk [vmem:[#allocation2] sm:$0x3] %vm45_vm1, %v286_v10  ;;  %196 = vmatprep.subr.mxu0 %v286_v10  ;;  %198 = vmatprep.mubr.msk.f32.mxu0 %vm287_vm2, %v286_v10  ;;  %vm79_vm3 = vcmask 1041409   ;;  %vm97_vm4 = vcmask 31744  }
  0x2a   :  { %v59_v8 = vadd.f32 %v58_v5, %v57_v3  ;;  %v64_v9 = vadd.f32 %v63_v7, %v62_v6  ;;  %197 = vmatpush3.msk.msra.mxu0 %vm56_vm0, %v89_v11  ;;  %v73_v16 = vsub.s32 %v70_v13, %v72_v14  ;;  %s181_s12 = sshll.u32 %s288_s11, 4  ;;  %s182_s12 = int_to_ptr.vmem [resolvable:$true] %s181_s12 }
  0x2b   :  { %s254_s13 = scalar_lea.vmem %s182_s12, 32  ;;  %p259_p3 = scmp.lt.s32.totalorder %s182_s12, %s182_s12 }
  0x2c   :  { %60 = vadd.xlane.f32.xlu0 %v59_v8  ;;  %p255_p2 = scmp.ne.s32.totalorder %s182_s12, %s254_s13  ;;  %p260_p4 = scmp.lt.s32.totalorder %s254_s13, %s254_s13 }
  0x2e   :  { %p261_p5 = por %p260_p4, %p259_p3 }
  0x30   :  { %65 = vadd.xlane.f32.xlu0 %v64_v9  ;;  %v49_v20 = vld [vmem:[#allocation2] sm:$0x3]  ;;  %p262_p6 = pnand %p261_p5, %p255_p2 }
  0xb9   :  { %v61_v15 = vpop.xlane.xlu0 %60 }
  0xba   :  { %v74_v18 = vrot.slane %v61_v15, %v73_v16 }
  0xbd   :  { %v66_v17 = vpop.xlane.xlu0 %65 }
  0xbe   :  { %v78_v19 = vrot.slane %v66_v17, %v73_v16 }
  0xc0   :  { %v80_v21 = vsel %vm79_vm3, %v78_v19, %v74_v18 }
  0xc1   :  { %v82_v22 = vadd.f32 %v80_v21, %v49_v20 }
  0xc3   :  { %84 = vst.msk [vmem:[#allocation2] sm:$0x3] %vm45_vm1, %v82_v22 }
  0xca   :  { %v88_v23 = vld [vmem:[#allocation2] sm:$0x3] }
  0xcb   :  { %199 = vmatmul.mubr.msk.f32.vlgmr.msra.gmra.mrb[0].mxu0 %vm97_vm4, %v88_v23 }
 0x19e   :  { %v170_v25 = vpop.f32.mrb[0].mxu0 }
 0x19f   :  { %v171_v26 = vadd.f32 %v191_v24, %v170_v25  ;;  %v200_v27 = vpop.f32.mrb[1].mxu0 }
 0x1a1   :  { %174 = vst [vmem:[#allocation8] sm:$0x3] %v171_v26 }
 0x1a2   :  { %265 = shalt.err (!%p262_p6)
}
 0x1a3   :  { %s266_s16 = scalar_lea.hbm %s358_s3, 32 }
 0x1a4   :  { %p267_p7 = scmp.ne.s32.totalorder %s358_s3, %s266_s16  ;;  %p270_p8 = scmp.lt.u32.totalorder %s266_s16, %s358_s3 }
 0x1a6   :  { %p272_p9 = pnand %p270_p8, %p267_p7 }
 0x1a8   :  { %275 = shalt.err (!%p272_p9)
}
 0x1a9   :  { %184 = dma.vmem_to_hbm [thread:$0]  %s182_s12, 32, %s358_s3, [#allocation5]  }
 0x1aa   :  { %280 = dma.done.wait [#allocation5], 32  }
 0x1ab   :  { %281 = vsyncadd [#allocation5], 4294967264 }
 0x1ac   :  { %188 = vsyncpa [#allocation4], 1 }
 0x1ad   :  { %189 = vsyncpa [#allocation7], 1 }
 0x1ae   :  { %190 = vsyncpa [#allocation5], 1 }

</bundles_post_ra>
